<compile_context>
chip_gen: v5e
topology: v5e:2x2
jax: 0.10.0
libtpu: 0.0.40
codegen_flags: <defaults>
</compile_context>

<pallas_src>
import functools

import jax
import jax.numpy as jnp
from jax import lax
from jax.experimental import pallas as pl
from jax.experimental.pallas import tpu as pltpu

EPS = 1e-5  # PyTorch InstanceNorm2d default (affine=False, track_running_stats=False)


def _conv3x3(xf, w_ref, masks, *, W, HW):
    """3x3 conv with ReflectionPad2d(1) on the lane-dense (C, H*W) layout.

    Reflection shifts are XLU lane rotations + border selects (no padded
    (C, H+2, W+2) tensor).  Each kh-group of 3 taps is cast to bf16, stacked
    into a (3C, HW) slab and contracted on the MXU against the matching
    (C, 3C) bf16 weight slice, accumulating in f32.  Conv bias is intentionally
    omitted: it cancels exactly under InstanceNorm2d(affine=False).
    """
    first_col, last_col, first_row, last_row = masks
    C = xf.shape[0]

    # Column (w) shifts, shared by all three kh groups (f32 math: safe on v5e).
    from_left = pltpu.roll(xf, 1 % HW, axis=1)            # value at flat j-1
    from_right = pltpu.roll(xf, (HW - 1) % HW, axis=1)     # value at flat j+1
    xl = jnp.where(first_col, from_right, from_left)       # x[h, reflect(w-1)]
    xr = jnp.where(last_col, from_left, from_right)        # x[h, reflect(w+1)]
    cols = (xl, xf, xr)                                     # kw = 0, 1, 2

    def kh_group(kh):
        taps = []
        for c in cols:
            if kh == 1:
                tap = c
            else:
                above = pltpu.roll(c, W % HW, axis=1)        # c[h-1, w]
                below = pltpu.roll(c, (HW - W) % HW, axis=1)  # c[h+1, w]
                if kh == 0:
                    tap = jnp.where(first_row, below, above)  # c[reflect(h-1), w]
                else:
                    tap = jnp.where(last_row, above, below)   # c[reflect(h+1), w]
            taps.append(tap.astype(jnp.bfloat16))             # cast BEFORE concat
        return jnp.concatenate(taps, axis=0)                  # (3C, HW) bf16

    acc = None
    for kh in range(3):
        part = jnp.dot(w_ref[kh], kh_group(kh),
                       preferred_element_type=jnp.float32)
        acc = part if acc is None else acc + part
    return acc


def _instance_norm(y, inv_hw):
    # Single pass: one sum + one sum-of-squares cross-lane reduction (XLU);
    # rsqrt goes to the EUP slot.  Variance clamped at 0 (single-pass formula
    # can cancel slightly negative in f32).
    s = jnp.sum(y, axis=-1, keepdims=True)
    ss = jnp.sum(y * y, axis=-1, keepdims=True)
    mean = s * inv_hw
    var = jnp.maximum(ss * inv_hw - mean * mean, 0.0)
    return (y - mean) * lax.rsqrt(var + EPS)


def residual_block_kernel(x_ref, w1_ref, w2_ref, o_ref, *, H, W):
    C, HW = x_ref.shape[1], x_ref.shape[2]
    inv_hw = 1.0 / (H * W)

    x = x_ref[0].astype(jnp.float32)                      # (C, H*W), lane-dense

    # Border masks hoisted once and shared by both convs (JAX won't CSE them).
    lane = lax.broadcasted_iota(jnp.int32, (C, HW), 1)
    col = lane % W
    masks = (col == 0, col == (W - 1), lane < W, lane >= (HW - W))

    # conv1 -> InstanceNorm -> ReLU
    y = _conv3x3(x, w1_ref, masks, W=W, HW=HW)
    y = jnp.maximum(_instance_norm(y, inv_hw), 0.0)

    # conv2 -> InstanceNorm
    z = _instance_norm(_conv3x3(y, w2_ref, masks, W=W, HW=HW), inv_hw)

    # Residual add; (1, C, H*W) output block -> lane-dense stores
    # (unmasked when H*W is a multiple of 128).
    o_ref[0] = (x + z).astype(o_ref.dtype)


def residual_block(x, w1, b1, w2, b2):
    # b1 / b2 are accepted for interface parity with the PyTorch module but are
    # mathematically no-ops: InstanceNorm2d(affine=False) subtracts the
    # per-channel mean over H*W, so the conv bias cancels exactly.
    del b1, b2
    N, C, H, W = x.shape
    assert H >= 2 and W >= 2, "ReflectionPad2d(1) requires H, W >= 2"
    HW = H * W
    # NOTE: H*W should be a multiple of 128 for unmasked lane-dense stores
    # (perf only; the kernel is correct for any H, W >= 2).

    # Lane-dense activation layout for the kernel: (N, C, H*W).
    xf = x.reshape(N, C, HW)

    # PyTorch conv weight (C_out, C_in, 3, 3) -> (kh, C_out, kw*C_in), ordered
    # to match the kh-group patch slabs (kw major, c_in minor).  Pre-cast to
    # bf16 (native MXU operand dtype), halving weight DMA traffic.
    def wmat(w):
        return (jnp.transpose(w, (2, 0, 3, 1))
                .reshape(3, C, 3 * C).astype(jnp.bfloat16))

    w1m, w2m = wmat(w1), wmat(w2)

    # Explicit VMEM budget: double-buffered I/O blocks + weights, one bf16
    # kh-group patch slab, and f32 temporaries (x, xl, xr, rolls, y, acc, ...).
    act = C * HW * 4
    est = (2 * 2 * act                    # in + out (1,C,HW) blocks, double-buffered
           + 2 * 2 * 9 * C * C * 2        # two (3,C,3C) bf16 weights, double-buffered
           + 3 * C * HW * 2               # one (3C,HW) bf16 patch slab
           + 10 * act)                    # f32 temporaries / masks headroom
    vmem_limit = int(min(max(2 * est, 32 << 20), 64 << 20))

    kernel = functools.partial(residual_block_kernel, H=H, W=W)

    out = pl.pallas_call(
        kernel,
        out_shape=jax.ShapeDtypeStruct((N, C, HW), x.dtype),
        grid_spec=pltpu.PrefetchScalarGridSpec(
            num_scalar_prefetch=0,
            grid=(N,),
            in_specs=[
                # If per-image compute is too short to hide the input DMA, bump
                # this spec to pipeline_mode=pl.Buffered(3).
                pl.BlockSpec((1, C, HW), lambda n: (n, 0, 0)),
                pl.BlockSpec((3, C, 3 * C), lambda n: (0, 0, 0)),
                pl.BlockSpec((3, C, 3 * C), lambda n: (0, 0, 0)),
            ],
            out_specs=pl.BlockSpec((1, C, HW), lambda n: (n, 0, 0)),
        ),
        # Batch axis is parallel -> megacore / dual-TC sharding when N > 1.
        # TODO(synk): for v7x with N == 1, add a second parallel grid axis
        # (channel groups for conv1 or H-row bands with a finalize step) so both
        # TensorCores are used.
        compiler_params=pltpu.CompilerParams(
            dimension_semantics=("parallel",),
            vmem_limit_bytes=vmem_limit),
    )(xf, w1m, w2m)

    return out.reshape(N, C, H, W)


def reference(x, w1, b1, w2, b2):
    # Pure-JAX f32 (HIGHEST precision) reference of the PyTorch forward pass
    # (biases included here, verifying that dropping them in-kernel is exact).
    def refpad(a):
        return jnp.pad(a, ((0, 0), (0, 0), (1, 1), (1, 1)), mode="reflect")

    def conv(a, w, b):
        y = lax.conv_general_dilated(
            a, w, (1, 1), "VALID",
            dimension_numbers=("NCHW", "OIHW", "NCHW"),
            precision=lax.Precision.HIGHEST)
        return y + b[None, :, None, None]

    def inorm(a):
        m = jnp.mean(a, axis=(2, 3), keepdims=True)
        v = jnp.mean((a - m) ** 2, axis=(2, 3), keepdims=True)
        return (a - m) * lax.rsqrt(v + EPS)

    y = jnp.maximum(inorm(conv(refpad(x), w1, b1)), 0.0)
    z = inorm(conv(refpad(y), w2, b2))
    return x + z


if __name__ == "__main__":
    N, C, H, W = 2, 4, 16, 16
    key = jax.random.PRNGKey(0)
    kx, kw1, kb1, kw2, kb2 = jax.random.split(key, 5)

    x = jax.random.normal(kx, (N, C, H, W), jnp.float32)

    # Deterministic init mimicking PyTorch Conv2d default (uniform +-1/sqrt(fan_in))
    fan_in = C * 3 * 3
    bound = 1.0 / jnp.sqrt(fan_in)
    w1 = jax.random.uniform(kw1, (C, C, 3, 3), jnp.float32, -bound, bound)
    b1 = jax.random.uniform(kb1, (C,), jnp.float32, -bound, bound)
    w2 = jax.random.uniform(kw2, (C, C, 3, 3), jnp.float32, -bound, bound)
    b2 = jax.random.uniform(kb2, (C,), jnp.float32, -bound, bound)

    out = jax.block_until_ready(residual_block(x, w1, b1, w2, b2))
    ref = jax.block_until_ready(reference(x, w1, b1, w2, b2))

    assert out.shape == (N, C, H, W) and out.dtype == x.dtype
    # Kernel uses the native bf16 MXU path; tolerance vs the f32 HIGHEST
    # reference is relaxed accordingly.
    max_err = float(jnp.max(jnp.abs(out - ref)))
    assert max_err < 5e-2, max_err

    print("KERNEL_OK")
</pallas_src>

<mosaic_0001>
module attributes {stable_mosaic.version = 11 : i64} {
  func.func @residual_block_kernel(%arg0: i32, %arg1: memref<1x4x256xf32, #tpu.memory_space<vmem>>, %arg2: memref<3x4x12xbf16, #tpu.memory_space<vmem>>, %arg3: memref<3x4x12xbf16, #tpu.memory_space<vmem>>, %arg4: memref<1x4x256xf32, #tpu.memory_space<vmem>>) attributes {dimension_semantics = [#tpu.dimension_semantics<parallel>], iteration_bounds = array<i64: 2>, scalar_prefetch = 0 : i64, scratch_operands = 0 : i64, tpu.core_type = #tpu.core_type<tc>, window_params = [{transform_indices = @transform_0, window_bounds = array<i64: 1, 4, 256>}, {pipeline_mode = #tpu.pipeline_mode<synchronous>, transform_indices = @transform_1, window_bounds = array<i64: 3, 4, 12>}, {pipeline_mode = #tpu.pipeline_mode<synchronous>, transform_indices = @transform_2, window_bounds = array<i64: 3, 4, 12>}, {transform_indices = @transform_3, window_bounds = array<i64: 1, 4, 256>}]} {
    %c0 = arith.constant 0 : index
    %c0_0 = arith.constant 0 : index
    %c0_1 = arith.constant 0 : index
    %0 = vector.load %arg1[%c0, %c0_0, %c0_1] : memref<1x4x256xf32, #tpu.memory_space<vmem>>, vector<1x4x256xf32>
    %1 = vector.shape_cast %0 : vector<1x4x256xf32> to vector<4x256xf32>
    %2 = tpu.iota {dimensions = array<i32: 1>} : vector<4x256xi32>
    %c16_i32 = arith.constant 16 : i32
    %c0_i32 = arith.constant 0 : i32
    %3 = arith.cmpi eq, %c16_i32, %c0_i32 : i32
    %c1_i32 = arith.constant 1 : i32
    %4 = arith.select %3, %c1_i32, %c16_i32 : i32
    %5 = vector.broadcast %4 : i32 to vector<4x256xi32>
    %6 = arith.remsi %2, %5 : vector<4x256xi32>
    %c0_i32_2 = arith.constant 0 : i32
    %7 = vector.broadcast %c0_i32_2 : i32 to vector<4x256xi32>
    %8 = arith.cmpi ne, %6, %7 : vector<4x256xi32>
    %c0_i32_3 = arith.constant 0 : i32
    %9 = vector.broadcast %c0_i32_3 : i32 to vector<4x256xi32>
    %10 = arith.cmpi slt, %6, %9 : vector<4x256xi32>
    %c0_i32_4 = arith.constant 0 : i32
    %11 = arith.cmpi slt, %4, %c0_i32_4 : i32
    %12 = vector.broadcast %11 : i1 to vector<4x256xi1>
    %13 = vector.broadcast %12 : vector<4x256xi1> to vector<4x256xi1>
    %14 = arith.xori %10, %13 : vector<4x256xi1>
    %15 = arith.andi %14, %8 : vector<4x256xi1>
    %16 = vector.broadcast %4 : i32 to vector<4x256xi32>
    %17 = arith.addi %6, %16 : vector<4x256xi32>
    %18 = arith.select %15, %17, %6 : vector<4x256xi1>, vector<4x256xi32>
    %c0_i32_5 = arith.constant 0 : i32
    %19 = vector.broadcast %c0_i32_5 : i32 to vector<4x256xi32>
    %20 = arith.cmpi eq, %18, %19 : vector<4x256xi32>
    %c15_i32 = arith.constant 15 : i32
    %21 = vector.broadcast %c15_i32 : i32 to vector<4x256xi32>
    %22 = arith.cmpi eq, %18, %21 : vector<4x256xi32>
    %c16_i32_6 = arith.constant 16 : i32
    %23 = vector.broadcast %c16_i32_6 : i32 to vector<4x256xi32>
    %24 = arith.cmpi slt, %2, %23 : vector<4x256xi32>
    %c240_i32 = arith.constant 240 : i32
    %25 = vector.broadcast %c240_i32 : i32 to vector<4x256xi32>
    %26 = arith.cmpi sge, %2, %25 : vector<4x256xi32>
    %c1_i32_7 = arith.constant 1 : i32
    %27 = tpu.dynamic_rotate %1 by %c1_i32_7 dim 1 : vector<4x256xf32>, i32 -> vector<4x256xf32>
    %c255_i32 = arith.constant 255 : i32
    %28 = tpu.dynamic_rotate %1 by %c255_i32 dim 1 : vector<4x256xf32>, i32 -> vector<4x256xf32>
    %29 = arith.select %20, %28, %27 : vector<4x256xi1>, vector<4x256xf32>
    %30 = arith.select %22, %27, %28 : vector<4x256xi1>, vector<4x256xf32>
    %c0_8 = arith.constant 0 : index
    %c0_9 = arith.constant 0 : index
    %c0_10 = arith.constant 0 : index
    %31 = vector.load %arg2[%c0_8, %c0_9, %c0_10] : memref<3x4x12xbf16, #tpu.memory_space<vmem>>, vector<1x4x12xbf16>
    %32 = vector.shape_cast %31 : vector<1x4x12xbf16> to vector<4x12xbf16>
    %c16_i32_11 = arith.constant 16 : i32
    %33 = tpu.dynamic_rotate %29 by %c16_i32_11 dim 1 : vector<4x256xf32>, i32 -> vector<4x256xf32>
    %c240_i32_12 = arith.constant 240 : i32
    %34 = tpu.dynamic_rotate %29 by %c240_i32_12 dim 1 : vector<4x256xf32>, i32 -> vector<4x256xf32>
    %35 = arith.select %24, %34, %33 : vector<4x256xi1>, vector<4x256xf32>
    %36 = arith.truncf %35 : vector<4x256xf32> to vector<4x256xbf16>
    %c16_i32_13 = arith.constant 16 : i32
    %37 = tpu.dynamic_rotate %1 by %c16_i32_13 dim 1 : vector<4x256xf32>, i32 -> vector<4x256xf32>
    %c240_i32_14 = arith.constant 240 : i32
    %38 = tpu.dynamic_rotate %1 by %c240_i32_14 dim 1 : vector<4x256xf32>, i32 -> vector<4x256xf32>
    %39 = arith.select %24, %38, %37 : vector<4x256xi1>, vector<4x256xf32>
    %40 = arith.truncf %39 : vector<4x256xf32> to vector<4x256xbf16>
    %c16_i32_15 = arith.constant 16 : i32
    %41 = tpu.dynamic_rotate %30 by %c16_i32_15 dim 1 : vector<4x256xf32>, i32 -> vector<4x256xf32>
    %c240_i32_16 = arith.constant 240 : i32
    %42 = tpu.dynamic_rotate %30 by %c240_i32_16 dim 1 : vector<4x256xf32>, i32 -> vector<4x256xf32>
    %43 = arith.select %24, %42, %41 : vector<4x256xi1>, vector<4x256xf32>
    %44 = arith.truncf %43 : vector<4x256xf32> to vector<4x256xbf16>
    %45 = tpu.concatenate %36, %40, %44 in 0 : vector<4x256xbf16>, vector<4x256xbf16>, vector<4x256xbf16> -> vector<12x256xbf16>
    %cst = arith.constant dense<0.000000e+00> : vector<4x256xf32>
    %46 = tpu.matmul %32, %45, %cst {dimension_numbers = #tpu.dot_dimension_numbers<[1], [0], [0], [1], [0, 0, 1, 1], [], []>} : vector<4x12xbf16>, vector<12x256xbf16>, vector<4x256xf32> -> vector<4x256xf32>
    %c1 = arith.constant 1 : index
    %c0_17 = arith.constant 0 : index
    %c0_18 = arith.constant 0 : index
    %47 = vector.load %arg2[%c1, %c0_17, %c0_18] : memref<3x4x12xbf16, #tpu.memory_space<vmem>>, vector<1x4x12xbf16>
    %48 = vector.shape_cast %47 : vector<1x4x12xbf16> to vector<4x12xbf16>
    %49 = arith.truncf %29 : vector<4x256xf32> to vector<4x256xbf16>
    %50 = arith.truncf %1 : vector<4x256xf32> to vector<4x256xbf16>
    %51 = arith.truncf %30 : vector<4x256xf32> to vector<4x256xbf16>
    %52 = tpu.concatenate %49, %50, %51 in 0 : vector<4x256xbf16>, vector<4x256xbf16>, vector<4x256xbf16> -> vector<12x256xbf16>
    %cst_19 = arith.constant dense<0.000000e+00> : vector<4x256xf32>
    %53 = tpu.matmul %48, %52, %cst_19 {dimension_numbers = #tpu.dot_dimension_numbers<[1], [0], [0], [1], [0, 0, 1, 1], [], []>} : vector<4x12xbf16>, vector<12x256xbf16>, vector<4x256xf32> -> vector<4x256xf32>
    %54 = arith.addf %46, %53 : vector<4x256xf32>
    %c2 = arith.constant 2 : index
    %c0_20 = arith.constant 0 : index
    %c0_21 = arith.constant 0 : index
    %55 = vector.load %arg2[%c2, %c0_20, %c0_21] : memref<3x4x12xbf16, #tpu.memory_space<vmem>>, vector<1x4x12xbf16>
    %56 = vector.shape_cast %55 : vector<1x4x12xbf16> to vector<4x12xbf16>
    %c16_i32_22 = arith.constant 16 : i32
    %57 = tpu.dynamic_rotate %29 by %c16_i32_22 dim 1 : vector<4x256xf32>, i32 -> vector<4x256xf32>
    %c240_i32_23 = arith.constant 240 : i32
    %58 = tpu.dynamic_rotate %29 by %c240_i32_23 dim 1 : vector<4x256xf32>, i32 -> vector<4x256xf32>
    %59 = arith.select %26, %57, %58 : vector<4x256xi1>, vector<4x256xf32>
    %60 = arith.truncf %59 : vector<4x256xf32> to vector<4x256xbf16>
    %c16_i32_24 = arith.constant 16 : i32
    %61 = tpu.dynamic_rotate %1 by %c16_i32_24 dim 1 : vector<4x256xf32>, i32 -> vector<4x256xf32>
    %c240_i32_25 = arith.constant 240 : i32
    %62 = tpu.dynamic_rotate %1 by %c240_i32_25 dim 1 : vector<4x256xf32>, i32 -> vector<4x256xf32>
    %63 = arith.select %26, %61, %62 : vector<4x256xi1>, vector<4x256xf32>
    %64 = arith.truncf %63 : vector<4x256xf32> to vector<4x256xbf16>
    %c16_i32_26 = arith.constant 16 : i32
    %65 = tpu.dynamic_rotate %30 by %c16_i32_26 dim 1 : vector<4x256xf32>, i32 -> vector<4x256xf32>
    %c240_i32_27 = arith.constant 240 : i32
    %66 = tpu.dynamic_rotate %30 by %c240_i32_27 dim 1 : vector<4x256xf32>, i32 -> vector<4x256xf32>
    %67 = arith.select %26, %65, %66 : vector<4x256xi1>, vector<4x256xf32>
    %68 = arith.truncf %67 : vector<4x256xf32> to vector<4x256xbf16>
    %69 = tpu.concatenate %60, %64, %68 in 0 : vector<4x256xbf16>, vector<4x256xbf16>, vector<4x256xbf16> -> vector<12x256xbf16>
    %cst_28 = arith.constant dense<0.000000e+00> : vector<4x256xf32>
    %70 = tpu.matmul %56, %69, %cst_28 {dimension_numbers = #tpu.dot_dimension_numbers<[1], [0], [0], [1], [0, 0, 1, 1], [], []>} : vector<4x12xbf16>, vector<12x256xbf16>, vector<4x256xf32> -> vector<4x256xf32>
    %71 = arith.addf %54, %70 : vector<4x256xf32>
    %cst_29 = arith.constant dense<0.000000e+00> : vector<4xf32>
    %72 = vector.multi_reduction <add>, %71, %cst_29 [1] : vector<4x256xf32> to vector<4xf32>
    %73 = vector.shape_cast %72 : vector<4xf32> to vector<4x1xf32>
    %74 = arith.mulf %71, %71 : vector<4x256xf32>
    %cst_30 = arith.constant dense<0.000000e+00> : vector<4xf32>
    %75 = vector.multi_reduction <add>, %74, %cst_30 [1] : vector<4x256xf32> to vector<4xf32>
    %76 = vector.shape_cast %75 : vector<4xf32> to vector<4x1xf32>
    %cst_31 = arith.constant 3.906250e-03 : f32
    %77 = vector.broadcast %cst_31 : f32 to vector<4x1xf32>
    %78 = arith.mulf %73, %77 : vector<4x1xf32>
    %cst_32 = arith.constant 3.906250e-03 : f32
    %79 = vector.broadcast %cst_32 : f32 to vector<4x1xf32>
    %80 = arith.mulf %76, %79 : vector<4x1xf32>
    %81 = arith.mulf %78, %78 : vector<4x1xf32>
    %82 = arith.subf %80, %81 : vector<4x1xf32>
    %cst_33 = arith.constant 0.000000e+00 : f32
    %83 = vector.broadcast %cst_33 : f32 to vector<4x1xf32>
    %84 = arith.maximumf %82, %83 : vector<4x1xf32>
    %85 = vector.broadcast %78 : vector<4x1xf32> to vector<4x256xf32>
    %86 = arith.subf %71, %85 : vector<4x256xf32>
    %cst_34 = arith.constant 9.99999974E-6 : f32
    %87 = vector.broadcast %cst_34 : f32 to vector<4x1xf32>
    %88 = arith.addf %84, %87 : vector<4x1xf32>
    %89 = math.rsqrt %88 : vector<4x1xf32>
    %90 = vector.broadcast %89 : vector<4x1xf32> to vector<4x256xf32>
    %91 = arith.mulf %86, %90 : vector<4x256xf32>
    %cst_35 = arith.constant 0.000000e+00 : f32
    %92 = vector.broadcast %cst_35 : f32 to vector<4x256xf32>
    %93 = arith.maximumf %91, %92 : vector<4x256xf32>
    %c1_i32_36 = arith.constant 1 : i32
    %94 = tpu.dynamic_rotate %93 by %c1_i32_36 dim 1 : vector<4x256xf32>, i32 -> vector<4x256xf32>
    %c255_i32_37 = arith.constant 255 : i32
    %95 = tpu.dynamic_rotate %93 by %c255_i32_37 dim 1 : vector<4x256xf32>, i32 -> vector<4x256xf32>
    %96 = arith.select %20, %95, %94 : vector<4x256xi1>, vector<4x256xf32>
    %97 = arith.select %22, %94, %95 : vector<4x256xi1>, vector<4x256xf32>
    %c0_38 = arith.constant 0 : index
    %c0_39 = arith.constant 0 : index
    %c0_40 = arith.constant 0 : index
    %98 = vector.load %arg3[%c0_38, %c0_39, %c0_40] : memref<3x4x12xbf16, #tpu.memory_space<vmem>>, vector<1x4x12xbf16>
    %99 = vector.shape_cast %98 : vector<1x4x12xbf16> to vector<4x12xbf16>
    %c16_i32_41 = arith.constant 16 : i32
    %100 = tpu.dynamic_rotate %96 by %c16_i32_41 dim 1 : vector<4x256xf32>, i32 -> vector<4x256xf32>
    %c240_i32_42 = arith.constant 240 : i32
    %101 = tpu.dynamic_rotate %96 by %c240_i32_42 dim 1 : vector<4x256xf32>, i32 -> vector<4x256xf32>
    %102 = arith.select %24, %101, %100 : vector<4x256xi1>, vector<4x256xf32>
    %103 = arith.truncf %102 : vector<4x256xf32> to vector<4x256xbf16>
    %c16_i32_43 = arith.constant 16 : i32
    %104 = tpu.dynamic_rotate %93 by %c16_i32_43 dim 1 : vector<4x256xf32>, i32 -> vector<4x256xf32>
    %c240_i32_44 = arith.constant 240 : i32
    %105 = tpu.dynamic_rotate %93 by %c240_i32_44 dim 1 : vector<4x256xf32>, i32 -> vector<4x256xf32>
    %106 = arith.select %24, %105, %104 : vector<4x256xi1>, vector<4x256xf32>
    %107 = arith.truncf %106 : vector<4x256xf32> to vector<4x256xbf16>
    %c16_i32_45 = arith.constant 16 : i32
    %108 = tpu.dynamic_rotate %97 by %c16_i32_45 dim 1 : vector<4x256xf32>, i32 -> vector<4x256xf32>
    %c240_i32_46 = arith.constant 240 : i32
    %109 = tpu.dynamic_rotate %97 by %c240_i32_46 dim 1 : vector<4x256xf32>, i32 -> vector<4x256xf32>
    %110 = arith.select %24, %109, %108 : vector<4x256xi1>, vector<4x256xf32>
    %111 = arith.truncf %110 : vector<4x256xf32> to vector<4x256xbf16>
    %112 = tpu.concatenate %103, %107, %111 in 0 : vector<4x256xbf16>, vector<4x256xbf16>, vector<4x256xbf16> -> vector<12x256xbf16>
    %cst_47 = arith.constant dense<0.000000e+00> : vector<4x256xf32>
    %113 = tpu.matmul %99, %112, %cst_47 {dimension_numbers = #tpu.dot_dimension_numbers<[1], [0], [0], [1], [0, 0, 1, 1], [], []>} : vector<4x12xbf16>, vector<12x256xbf16>, vector<4x256xf32> -> vector<4x256xf32>
    %c1_48 = arith.constant 1 : index
    %c0_49 = arith.constant 0 : index
    %c0_50 = arith.constant 0 : index
    %114 = vector.load %arg3[%c1_48, %c0_49, %c0_50] : memref<3x4x12xbf16, #tpu.memory_space<vmem>>, vector<1x4x12xbf16>
    %115 = vector.shape_cast %114 : vector<1x4x12xbf16> to vector<4x12xbf16>
    %116 = arith.truncf %96 : vector<4x256xf32> to vector<4x256xbf16>
    %117 = arith.truncf %93 : vector<4x256xf32> to vector<4x256xbf16>
    %118 = arith.truncf %97 : vector<4x256xf32> to vector<4x256xbf16>
    %119 = tpu.concatenate %116, %117, %118 in 0 : vector<4x256xbf16>, vector<4x256xbf16>, vector<4x256xbf16> -> vector<12x256xbf16>
    %cst_51 = arith.constant dense<0.000000e+00> : vector<4x256xf32>
    %120 = tpu.matmul %115, %119, %cst_51 {dimension_numbers = #tpu.dot_dimension_numbers<[1], [0], [0], [1], [0, 0, 1, 1], [], []>} : vector<4x12xbf16>, vector<12x256xbf16>, vector<4x256xf32> -> vector<4x256xf32>
    %121 = arith.addf %113, %120 : vector<4x256xf32>
    %c2_52 = arith.constant 2 : index
    %c0_53 = arith.constant 0 : index
    %c0_54 = arith.constant 0 : index
    %122 = vector.load %arg3[%c2_52, %c0_53, %c0_54] : memref<3x4x12xbf16, #tpu.memory_space<vmem>>, vector<1x4x12xbf16>
    %123 = vector.shape_cast %122 : vector<1x4x12xbf16> to vector<4x12xbf16>
    %c16_i32_55 = arith.constant 16 : i32
    %124 = tpu.dynamic_rotate %96 by %c16_i32_55 dim 1 : vector<4x256xf32>, i32 -> vector<4x256xf32>
    %c240_i32_56 = arith.constant 240 : i32
    %125 = tpu.dynamic_rotate %96 by %c240_i32_56 dim 1 : vector<4x256xf32>, i32 -> vector<4x256xf32>
    %126 = arith.select %26, %124, %125 : vector<4x256xi1>, vector<4x256xf32>
    %127 = arith.truncf %126 : vector<4x256xf32> to vector<4x256xbf16>
    %c16_i32_57 = arith.constant 16 : i32
    %128 = tpu.dynamic_rotate %93 by %c16_i32_57 dim 1 : vector<4x256xf32>, i32 -> vector<4x256xf32>
    %c240_i32_58 = arith.constant 240 : i32
    %129 = tpu.dynamic_rotate %93 by %c240_i32_58 dim 1 : vector<4x256xf32>, i32 -> vector<4x256xf32>
    %130 = arith.select %26, %128, %129 : vector<4x256xi1>, vector<4x256xf32>
    %131 = arith.truncf %130 : vector<4x256xf32> to vector<4x256xbf16>
    %c16_i32_59 = arith.constant 16 : i32
    %132 = tpu.dynamic_rotate %97 by %c16_i32_59 dim 1 : vector<4x256xf32>, i32 -> vector<4x256xf32>
    %c240_i32_60 = arith.constant 240 : i32
    %133 = tpu.dynamic_rotate %97 by %c240_i32_60 dim 1 : vector<4x256xf32>, i32 -> vector<4x256xf32>
    %134 = arith.select %26, %132, %133 : vector<4x256xi1>, vector<4x256xf32>
    %135 = arith.truncf %134 : vector<4x256xf32> to vector<4x256xbf16>
    %136 = tpu.concatenate %127, %131, %135 in 0 : vector<4x256xbf16>, vector<4x256xbf16>, vector<4x256xbf16> -> vector<12x256xbf16>
    %cst_61 = arith.constant dense<0.000000e+00> : vector<4x256xf32>
    %137 = tpu.matmul %123, %136, %cst_61 {dimension_numbers = #tpu.dot_dimension_numbers<[1], [0], [0], [1], [0, 0, 1, 1], [], []>} : vector<4x12xbf16>, vector<12x256xbf16>, vector<4x256xf32> -> vector<4x256xf32>
    %138 = arith.addf %121, %137 : vector<4x256xf32>
    %cst_62 = arith.constant dense<0.000000e+00> : vector<4xf32>
    %139 = vector.multi_reduction <add>, %138, %cst_62 [1] : vector<4x256xf32> to vector<4xf32>
    %140 = vector.shape_cast %139 : vector<4xf32> to vector<4x1xf32>
    %141 = arith.mulf %138, %138 : vector<4x256xf32>
    %cst_63 = arith.constant dense<0.000000e+00> : vector<4xf32>
    %142 = vector.multi_reduction <add>, %141, %cst_63 [1] : vector<4x256xf32> to vector<4xf32>
    %143 = vector.shape_cast %142 : vector<4xf32> to vector<4x1xf32>
    %cst_64 = arith.constant 3.906250e-03 : f32
    %144 = vector.broadcast %cst_64 : f32 to vector<4x1xf32>
    %145 = arith.mulf %140, %144 : vector<4x1xf32>
    %cst_65 = arith.constant 3.906250e-03 : f32
    %146 = vector.broadcast %cst_65 : f32 to vector<4x1xf32>
    %147 = arith.mulf %143, %146 : vector<4x1xf32>
    %148 = arith.mulf %145, %145 : vector<4x1xf32>
    %149 = arith.subf %147, %148 : vector<4x1xf32>
    %cst_66 = arith.constant 0.000000e+00 : f32
    %150 = vector.broadcast %cst_66 : f32 to vector<4x1xf32>
    %151 = arith.maximumf %149, %150 : vector<4x1xf32>
    %152 = vector.broadcast %145 : vector<4x1xf32> to vector<4x256xf32>
    %153 = arith.subf %138, %152 : vector<4x256xf32>
    %cst_67 = arith.constant 9.99999974E-6 : f32
    %154 = vector.broadcast %cst_67 : f32 to vector<4x1xf32>
    %155 = arith.addf %151, %154 : vector<4x1xf32>
    %156 = math.rsqrt %155 : vector<4x1xf32>
    %157 = vector.broadcast %156 : vector<4x1xf32> to vector<4x256xf32>
    %158 = arith.mulf %153, %157 : vector<4x256xf32>
    %159 = arith.addf %1, %158 : vector<4x256xf32>
    %c0_68 = arith.constant 0 : index
    %c0_69 = arith.constant 0 : index
    %c0_70 = arith.constant 0 : index
    %160 = vector.load %arg4[%c0_68, %c0_69, %c0_70] : memref<1x4x256xf32, #tpu.memory_space<vmem>>, vector<1x4x256xf32>
    %161 = vector.shape_cast %160 : vector<1x4x256xf32> to vector<4x256xf32>
    %162 = vector.shape_cast %159 : vector<4x256xf32> to vector<1x4x256xf32>
    tpu.vector_store %arg4[%c0_68, %c0_69, %c0_70], %162 {strides = array<i32>} : memref<1x4x256xf32, #tpu.memory_space<vmem>>, vector<1x4x256xf32>,
    return
  }
  func.func @transform_0(%arg0: i32) -> (i32, i32, i32) {
    %c0_i32 = arith.constant 0 : i32
    %c0_i32_0 = arith.constant 0 : i32
    %c0_i32_1 = arith.constant 0 : i32
    return %arg0, %c0_i32, %c0_i32_0 : i32, i32, i32
  }
  func.func @transform_1(%arg0: i32) -> (i32, i32, i32) {
    %c0_i32 = arith.constant 0 : i32
    %c0_i32_0 = arith.constant 0 : i32
    %c0_i32_1 = arith.constant 0 : i32
    %c0_i32_2 = arith.constant 0 : i32
    return %c0_i32, %c0_i32_0, %c0_i32_1 : i32, i32, i32
  }
  func.func @transform_2(%arg0: i32) -> (i32, i32, i32) {
    %c0_i32 = arith.constant 0 : i32
    %c0_i32_0 = arith.constant 0 : i32
    %c0_i32_1 = arith.constant 0 : i32
    %c0_i32_2 = arith.constant 0 : i32
    return %c0_i32, %c0_i32_0, %c0_i32_1 : i32, i32, i32
  }
  func.func @transform_3(%arg0: i32) -> (i32, i32, i32) {
    %c0_i32 = arith.constant 0 : i32
    %c0_i32_0 = arith.constant 0 : i32
    %c0_i32_1 = arith.constant 0 : i32
    return %arg0, %c0_i32, %c0_i32_0 : i32, i32, i32
  }
}

</mosaic_0001>

<bundles_post_ra>
// kernel: tpu_custom_call.1
= control target key start
LH: loop header
LB: loop body
LE: loop exit
PB: predicated region body
PF: predicated region fallthrough
CT: control target
= control target key end

     0   :  { %8 = vsyncpa [#allocation3], 0  ;;  %s1732_s0 = inlined_call_operand.hbm [shape: f32[2,4,256], index: 0, kind: input, shape index: {}]   ;;  %s1733_s1 = inlined_call_operand.hbm [shape: bf16[3,4,12], index: 1, kind: input, shape index: {}]   ;;  %s1734_s2 = inlined_call_operand.hbm [shape: bf16[3,4,12], index: 2, kind: input, shape index: {}]   ;;  %s1735_s3 = inlined_call_operand.hbm [shape: f32[2,4,256], index: 3, kind: output, shape index: {}]  }
   0x1   :  { %10 = vsyncpa [#allocation3 + $0x1], 0 }
   0x2   :  { %11 = vsyncpa [#allocation6], 0 }
   0x3   :  { %12 = vsyncpa [#allocation4], 0 }
   0x4   :  { %14 = vsyncpa [#allocation4 + $0x1], 0  ;;  %s1370_s12 = smov 0   ;;  %s1372_s13 = smov 0  }
   0x5   :  { %s1374_s14 = smov 0   ;;  %s1376_s15 = smov 0  }
   0x6 LB: > { %s130_s18 = sshll.u32 %s1733_s1, 4  ;;  %s1394_s19 = sadd.s32 4294967295, %s1340_s15   ;;  %s1340_s15 = sphi %s1376_s15, %s1754_s15   ;;  %s1336_s14 = sphi %s1374_s14, %s1753_s14   ;;  %s1332_s13 = sphi %s1372_s13, %s1752_s13   ;;  %s1328_s12 = sphi %s1370_s12, %s1751_s12   ;;  %s131_s18 = int_to_ptr.hbm [resolvable:$true] %s130_s18 }
   0x7   : > { %p992_p0 = scmp.ge.s32.totalorder %s1340_s15, 1  ;;  %p41_p1 = scmp.eq.s32.totalorder %s1394_s19, 0 }
   0x8   : > { %p119_p2 = scmp.lt.s32.totalorder %s1340_s15, 3  ;;  %s1342_s21 = smov [#allocation5]  }
   0x9   : > { %s132_s22 = sshll.u32 %s1342_s21, 4  ;;  %s144_s25 = sshll.u32 %s1734_s2, 4  ;;  %s133_s22 = int_to_ptr.vmem [resolvable:$true] %s132_s22  ;;  %s145_s25 = int_to_ptr.hbm [resolvable:$true] %s144_s25 }
   0xa   : > { %p1399_p3 = pnand %p992_p0, %p119_p2  ;;  %s1343_s26 = smov [#allocation7]  }
   0xb   : > { %s146_s27 = sshll.u32 %s1343_s26, 4  ;;  %s1344_s28 = smov 32   ;;  %s147_s27 = int_to_ptr.vmem [resolvable:$true] %s146_s27 }
   0xc   : > { %p1035_p4 = pneg %p1399_p3  ;;  %s1345_s29 = smov 2  }
   0xd   : > { %s991_s30 = sadd.s32 4294967294, %s1340_s15   ;;  %s1413_s4 = sadd.s32 1, %s1340_s15  }
   0xe   : > { %p1036_p6 = pnand %p1035_p4, %p41_p1  ;;  %s24_s5 = ssub.s32 %s1340_s15, %s1413_s4 }
   0xf   : > { %s27_s6 = sadd.s32 1, %s1336_s14  ;;  %p25_p7 = scmp.eq.s32.totalorder %s24_s5, 0 }
  0x10   : > { %1038 = dma.hbm_to_vmem [thread:$0]  (!%p1036_p6), %s131_s18, 96, %s133_s22, [#allocation6], %s1344_s28, %s1344_s28, %s1345_s29  }
  0x11   : > { %1041 = dma.hbm_to_vmem [thread:$0]  (!%p1036_p6), %s145_s25, 96, %s147_s27, [#allocation6], %s1344_s28, %s1344_s28, %s1345_s29  }
  0x12   : > { %p34_p8 = scmp.ne.s32.totalorder %s1336_s14, %s1332_s13  ;;  %p35_p9 = scmp.eq.s32.totalorder %s1340_s15, 0 }
  0x13   : > { %p40_p10 = scmp.ne.s32.totalorder %s1332_s13, %s1328_s12  ;;  %p106_p13 = scmp.eq.s32.totalorder %s1394_s19, 1 }
  0x14   : > { %s1424_s7 = scalar_select %p25_p7, %s1336_s14, %s27_s6  }
  0x15   : > { %p1426_p11 = por %p35_p9, %p34_p8  ;;  %p1432_p12 = por %p41_p1, %p40_p10 }
  0x16   : > { %p112_p0 = scmp.eq.s32.totalorder %s991_s30, 1  ;;  %p1052_p2 = scmp.lt.s32.totalorder %s1340_s15, 2 }
  0x17   : > { %s160_s10 = sand.u32 1, %s1336_s14   ;;  %p1439_p4 = por %p106_p13, %p34_p8 }
  0x18   : > { %p1443_p6 = por %p112_p0, %p40_p10  ;;  %s996_s17 = sshll.u32 %s160_s10, 3 }
  0x19   : > { %s1021_s18 = sshll.u32 %s1340_s15, 3  ;;  %s164_s24 = scalar_lea.vmem [#allocation2], %s996_s17 }
  0x1a   : > { %s169_s23 = scalar_lea.hbm %s1732_s0, %s1021_s18  ;;  %s173_s25 = sshll.u32 %s164_s24, 4  ;;  %s174_s25 = int_to_ptr.vmem [resolvable:$true] %s173_s25 }
  0x1b   : > { %s171_s26 = sshll.u32 %s169_s23, 4  ;;  %p1453_p7 = pnand %p1052_p2, %p1426_p11  ;;  %s172_s26 = int_to_ptr.hbm [resolvable:$true] %s171_s26 }
  0x1c   : > { %s161_s28 = scalar_lea.sflag [#allocation3], %s160_s10  ;;  %s1240_s29 = sshra.s32 %s172_s26, 4  ;;  %s1241_s29 = int_to_ptr.hbm [resolvable:$true] %s1240_s29 }
  0x1d   : > { %s1242_s30 = scalar_lea.hbm %s1241_s29, 8  ;;  %p1244_p9 = pneg %p1453_p7 }
  0x1e   : > { %p1243_p8 = scmp.ne.s32.totalorder %s1241_s29, %s1242_s30  ;;  %s1247_s17 = scalar_lea.hbm %s1732_s0, 16 }
  0x1f   : > { %p1248_p11 = scmp.lt.s32.totalorder %s1241_s29, %s1732_s0  ;;  %p1249_p0 = scmp.lt.s32.totalorder %s1247_s17, %s1242_s30 }
  0x20   : > { %p1245_p10 = pnand %p1244_p9, %p1243_p8 }
  0x21   : > { %p1250_p2 = por %p1249_p0, %p1248_p11 }
  0x22   : > { %p1246_p13 = pneg %p1245_p10 }
  0x24   : > { %p1251_p5 = pnand %p1250_p2, %p1246_p13 }
  0x26   : > { %1254 = shalt.err (!%p1251_p5)
}
  0x27   : > { %1045 = dma.hbm_to_vmem [thread:$0]  (!%p1453_p7), %s172_s26, 128, %s174_s25, %s161_s28  }
  0x28   : > { %182 = sbr.rel (%p1399_p3) target bundleno = 1168 (0x490), region = 32  ;;  %s1470_s10 = sand.u32 (!%p1399_p3), 1, %s1332_s13  }
  0x29   : > { %s1000_s21 = sshll.u32 (!%p1399_p3), %s1470_s10, 3  ;;  %s185_s22 = scalar_lea.sflag (!%p1399_p3), [#allocation3], %s1470_s10 }
  0x2a   : > { %s188_s23 = scalar_lea.vmem (!%p1399_p3), [#allocation2], %s1000_s21 }
  0x2d   : > { %1315 = dma.done.wait (%p1432_p12), %s185_s22, 128  }
  0x2e   : > { %1317 = vsyncadd (%p1432_p12), %s185_s22, 4294967168 }
  0x2f   : > { %1319 = dma.done.wait (%p41_p1), [#allocation6], 192  }
  0x30   : > { %1321 = vsyncadd (%p41_p1), [#allocation6], 4294967104  ;;  %v1484_v0 = vld [vmem:[%s188_s23] sm:$0xff]  ;;  %s1346_s20 = smov 1   ;;  %s1347_s9 = smov 127   ;;  %v224_v13 = vlaneseq  ;;  %vm362_vm6 = vcmask 1041408  }
  0x31   : > { %260 = vst [vmem:[#allocation1] ss:$2 sm:$0xff] %v1484_v0  ;;  %s1348_s24 = smov 16   ;;  %s1349_s25 = smov 112   ;;  %vm369_vm7 = vcmask 1043456   ;;  %vm415_vm8 = vcmask 1045504  }
  0x32   : > { %v1495_v14 = vand.u32 127, %v224_v13  ;;  %v375_v63 = vld [vmem:[#allocation5 + $0x2] sm:$0x3]  ;;  %vm411_vm9 = vcmask 97280   ;;  %s1022_s26 = sshll.u32 %s1394_s19, 3  ;;  %s221_s30 = scalar_lea.vmem [#allocation8], %s1000_s21 }
  0x33   : > { %s897_s29 = scalar_lea.hbm %s1735_s3, %s1022_s26  ;;  %s899_s5 = sshll.u32 %s221_s30, 4  ;;  %s900_s5 = int_to_ptr.vmem [resolvable:$true] %s899_s5 }
  0x34   : > { %v1498_v18 = vadd.s32 128, %v1495_v14  ;;  %v231_v20 = vand.u32 15, %v1495_v14  ;;  %vm269_vm0 = vcmp.lt.s32.totalorder %v1495_v14, 1  ;;  %vm281_vm1 = vcmp.lt.s32.totalorder %v1495_v14, 127  ;;  %s901_s6 = sshll.u32 %s897_s29, 4  ;;  %s886_s19 = scalar_lea.sflag [#allocation4], %s1470_s10  ;;  %s902_s6 = int_to_ptr.hbm [resolvable:$true] %s901_s6 }
  0x35   : > { %vm299_vm10 = vcmp.lt.s32.totalorder %v1495_v14, 112  ;;  %vm255_vm11 = vcmp.lt.s32.totalorder %v1495_v14, 16  ;;  %s1284_s17 = sshra.s32 %s902_s6, 4  ;;  %s1290_s21 = scalar_lea.hbm %s1735_s3, 16  ;;  %s1285_s17 = int_to_ptr.hbm [resolvable:$true] %s1284_s17 }
  0x36   : > { %v238_v21 = vand.u32 15, %v1498_v18  ;;  %vm1504_vm2 = vcmp.eq.s32.totalorder %v231_v20, 15  ;;  %vm1512_vm4 = vcmp.eq.s32.totalorder %v231_v20, 0  ;;  %vm258_vm12 = vcmp.ge.s32.totalorder %v1498_v18, 240  ;;  %s1286_s18 = scalar_lea.hbm %s1285_s17, 8  ;;  %p1291_p12 = scmp.lt.s32.totalorder %s1285_s17, %s1735_s3 }
  0x37   : > { %p1287_p1 = scmp.ne.s32.totalorder %s1285_s17, %s1286_s18  ;;  %p1292_p7 = scmp.lt.s32.totalorder %s1290_s21, %s1286_s18 }
  0x38   : > { %v261_v1 = vld.sshfl [vmem:[#allocation1] sm:$0xff pattern:$0x75316420]  ;;  %v262_v2 = vld.sshfl [vmem:[#allocation1 + $0x8] sm:$0xff pattern:$0x75316420] }
  0x39   : > { %v1096_v3 = vpack.i.bf16 %v262_v2, %v261_v1  ;;  %272 = vst [vmem:[#allocation1] ss:$2 sm:$0xff] %v1484_v0  ;;  %vm1508_vm3 = vcmp.eq.s32.totalorder %v238_v21, 15  ;;  %vm1516_vm5 = vcmp.eq.s32.totalorder %v238_v21, 0  ;;  %p1288_p3 = pnand %p1287_p1, %p1439_p4  ;;  %p1293_p8 = por %p1292_p7, %p1291_p12 }
  0x3b   : > { %1097 = vrot.lane.b32.xlu0 %v1096_v3, %s1346_s20  ;;  %p1289_p5 = pneg %p1288_p3 }
  0x3d   : > { %p1294_p9 = pnand %p1293_p8, %p1289_p5 }
  0x40   : > { %v273_v4 = vld.sshfl [vmem:[#allocation1] sm:$0xff pattern:$0x75316420]  ;;  %v274_v5 = vld.sshfl [vmem:[#allocation1 + $0x8] sm:$0xff pattern:$0x75316420] }
  0x41   : > { %v1101_v6 = vpack.i.bf16 %v274_v5, %v273_v4  ;;  %305 = vst [vmem:[#allocation1] ss:$2 sm:$0xff] %v1484_v0 }
  0x43   : > { %1102 = vrot.lane.b32.xlu0 %v1101_v6, %s1347_s9 }
  0x48   : > { %v306_v7 = vld.sshfl [vmem:[#allocation1] sm:$0xff pattern:$0x75316420]  ;;  %v307_v8 = vld.sshfl [vmem:[#allocation1 + $0x8] sm:$0xff pattern:$0x75316420] }
  0x49   : > { %v1106_v9 = vpack.i.bf16 %v307_v8, %v306_v7  ;;  %316 = vst [vmem:[#allocation1] ss:$2 sm:$0xff] %v1484_v0 }
  0x4b   : > { %1107 = vrot.lane.b32.xlu1 %v1106_v9, %s1348_s24 }
  0x50   : > { %v317_v10 = vld.sshfl [vmem:[#allocation1] sm:$0xff pattern:$0x75316420]  ;;  %v318_v11 = vld.sshfl [vmem:[#allocation1 + $0x8] sm:$0xff pattern:$0x75316420] }
  0x51   : > { %v1111_v12 = vpack.i.bf16 %v318_v11, %v317_v10  ;;  %377 = vst [vmem:[#allocation1] ss:$2 sm:$0xff] %v1484_v0 }
  0x53   : > { %1112 = vrot.lane.b32.xlu1 %v1111_v12, %s1349_s25 }
  0x58   : > { %v378_v15 = vld.sshfl [vmem:[#allocation1] sm:$0xff pattern:$0x75316420]  ;;  %v379_v16 = vld.sshfl [vmem:[#allocation1 + $0x8] sm:$0xff pattern:$0x75316420] }
  0x59   : > { %v382_v19 = vpack.c.bf16 %v379_v16, %v378_v15 }
  0x5b   : > { %v390_v22 = vunpack.c.l.b16 %v382_v19  ;;  %v391_v23 = vunpack.c.h.b16 %v382_v19 }
  0x5d   : > { %v392_v33 = vpack.c.b16 %v390_v22, %v390_v22  ;;  %v393_v34 = vpack.c.b16 %v391_v23, %v391_v23 }
  0x5f   : > { %v394_v48 = vrot.slane %v392_v33, 6  ;;  %v395_v50 = vrot.slane %v393_v34, 6 }
  0xad   : > { %v1098_v17 = vpop.permute.xlu0 %1097 }
  0xae   : > { %v1100_v24 = vunpack.i.h.bf16 %v1098_v17  ;;  %v1099_v25 = vunpack.i.l.bf16 %v1098_v17 }
  0xb0   : > { %v270_v35 = vsel %vm269_vm0, %v1099_v25, %v1100_v24  ;;  %v271_v36 = vsel %vm269_vm0, %v1100_v24, %v1099_v25 }
  0xb5   : > { %v1103_v26 = vpop.permute.xlu0 %1102 }
  0xb6   : > { %v1105_v29 = vunpack.i.h.bf16 %v1103_v26  ;;  %v1104_v30 = vunpack.i.l.bf16 %v1103_v26 }
  0xb8   : > { %v282_v37 = vsel %vm281_vm1, %v1104_v30, %v1105_v29  ;;  %v283_v38 = vsel %vm281_vm1, %v1105_v29, %v1104_v30 }
  0xb9   : > { %v286_v39 = vsel %vm1504_vm2, %v271_v36, %v282_v37  ;;  %v287_v40 = vsel %vm1508_vm3, %v270_v35, %v283_v38  ;;  %v284_v41 = vsel %vm1512_vm4, %v282_v37, %v271_v36  ;;  %v285_v42 = vsel %vm1516_vm5, %v283_v38, %v270_v35 }
  0xba   : > { %v1126_v43 = vpack.i.bf16 %v287_v40, %v286_v39  ;;  %v1116_v44 = vpack.i.bf16 %v285_v42, %v284_v41  ;;  %v376_v45 = vpack.c.bf16 %v285_v42, %v284_v41  ;;  %v383_v46 = vpack.c.bf16 %v287_v40, %v286_v39 }
  0xbc   : > { %1127 = vrot.lane.b32.xlu0 %v1126_v43, %s1348_s24  ;;  %1117 = vrot.lane.b32.xlu2 %v1116_v44, %s1348_s24  ;;  %v385_v47 = vunpack.c.l.b16 %v376_v45  ;;  %v386_v49 = vunpack.c.h.b16 %v376_v45  ;;  %v397_v51 = vunpack.c.l.b16 %v383_v46  ;;  %v398_v52 = vunpack.c.h.b16 %v383_v46 }
  0xbd   : > { %1132 = vrot.lane.b32.xlu1 %v1126_v43, %s1349_s25  ;;  %v1108_v1 = vpop.permute.xlu1 %1107 }
  0xbe   : > { %v387_v53 = vpack.c.b16 %v385_v47, %v385_v47  ;;  %v388_v54 = vpack.c.b16 %v386_v49, %v386_v49  ;;  %v399_v55 = vpack.c.b16 %v397_v51, %v397_v51  ;;  %v400_v56 = vpack.c.b16 %v398_v52, %v398_v52 }
  0xbf   : > { %v1110_v4 = vunpack.i.h.bf16 %v1108_v1  ;;  %v1109_v5 = vunpack.i.l.bf16 %v1108_v1 }
  0xc0   : > { %v403_v57 = vsel %vm362_vm6, %v387_v53, %v394_v48  ;;  %v406_v58 = vsel %vm362_vm6, %v388_v54, %v395_v50 }
  0xc1   : > { %v408_v59 = vsel %vm369_vm7, %v403_v57, %v399_v55  ;;  %v410_v60 = vsel %vm369_vm7, %v406_v58, %v400_v56  ;;  %v315_v9 = vsel %vm255_vm11, %v1110_v4, %v1109_v5  ;;  %v314_v11 = vsel %vm255_vm11, %v1109_v5, %v1110_v4 }
  0xc2   : > { %v416_v61 = vsel %vm415_vm8, %v408_v59, 0  ;;  %v418_v62 = vsel %vm415_vm8, %v410_v60, 0 }
  0xc3   : > { %427 = vmatpush.bf16.msra.mxu0 %v416_v61  ;;  %440 = vmatpush.bf16.msra.mxu1 %v418_v62 }
  0xc4   : > { %1122 = vrot.lane.b32.xlu2 %v1116_v44, %s1349_s25 }
  0xc5   : > { %v1113_v3 = vpop.permute.xlu1 %1112 }
  0xc6   : > { %1004 = vmatmul.msk.bf16.vlgmr.msra.gmra.mxu0 %vm411_vm9, %v375_v63  ;;  %1005 = vmatmul.msk.bf16.vlgmr.msra.gmra.mxu1 %vm411_vm9, %v375_v63  ;;  %v1115_v6 = vunpack.i.h.bf16 %v1113_v3  ;;  %v1114_v7 = vunpack.i.l.bf16 %v1113_v3 }
  0xc8   : > { %v325_v10 = vsel %vm299_vm10, %v1114_v7, %v1115_v6  ;;  %v326_v12 = vsel %vm299_vm10, %v1115_v6, %v1114_v7 }
  0xc9   : > { %v327_v16 = vsel %vm255_vm11, %v325_v10, %v315_v9  ;;  %v485_v20 = vsel %vm258_vm12, %v314_v11, %v326_v12 }
  0xca   : > { %v329_v21 = vpack.c.bf16 %v314_v11, %v327_v16  ;;  %v486_v23 = vpack.c.bf16 %v485_v20, %v325_v10 }
  0xcc   : > { %v351_v33 = vunpack.c.l.b16 %v329_v21  ;;  %v352_v34 = vunpack.c.h.b16 %v329_v21  ;;  %v496_v35 = vunpack.c.l.b16 %v486_v23  ;;  %v497_v36 = vunpack.c.h.b16 %v486_v23 }
  0xce   : > { %v353_v40 = vpack.c.b16 %v351_v33, %v351_v33  ;;  %v354_v41 = vpack.c.b16 %v352_v34, %v352_v34  ;;  %v498_v45 = vpack.c.b16 %v496_v35, %v496_v35  ;;  %v499_v46 = vpack.c.b16 %v497_v36, %v497_v36  ;;  %v480_v33 = vld [vmem:[#allocation5 + $0x4] sm:$0x3] }
  0xd0   : > { %v355_v59 = vrot.slane %v353_v40, 6  ;;  %v356_v60 = vrot.slane %v354_v41, 6  ;;  %v500_v63 = vrot.slane %v498_v45, 6  ;;  %v501_v1 = vrot.slane %v499_v46, 6 }
 0x116   : > { %v1118_v2 = vpop.permute.xlu2 %1117 }
 0x117   : > { %v1120_v17 = vunpack.i.h.bf16 %v1118_v2  ;;  %v1119_v19 = vunpack.i.l.bf16 %v1118_v2 }
 0x119   : > { %v294_v25 = vsel %vm255_vm11, %v1120_v17, %v1119_v19  ;;  %v293_v26 = vsel %vm255_vm11, %v1119_v19, %v1120_v17 }
 0x11e   : > { %v1123_v8 = vpop.permute.xlu2 %1122 }
 0x11f   : > { %v1125_v13 = vunpack.i.h.bf16 %v1123_v8  ;;  %v1124_v15 = vunpack.i.l.bf16 %v1123_v8 }
 0x121   : > { %v300_v22 = vsel %vm299_vm10, %v1124_v15, %v1125_v13  ;;  %v301_v24 = vsel %vm299_vm10, %v1125_v13, %v1124_v15 }
 0x122   : > { %v302_v29 = vsel %vm255_vm11, %v300_v22, %v294_v25  ;;  %v482_v30 = vsel %vm258_vm12, %v293_v26, %v301_v24 }
 0x123   : > { %v304_v37 = vpack.c.bf16 %v293_v26, %v302_v29  ;;  %v483_v38 = vpack.c.bf16 %v482_v30, %v300_v22  ;;  %v288_v30 = vld [vmem:[#allocation5] sm:$0x3] }
 0x125   : > { %v346_v49 = vunpack.c.l.b16 %v304_v37  ;;  %v347_v50 = vunpack.c.h.b16 %v304_v37  ;;  %v491_v53 = vunpack.c.l.b16 %v483_v38  ;;  %v492_v54 = vunpack.c.h.b16 %v483_v38 }
 0x127   : > { %v348_v2 = vpack.c.b16 %v346_v49, %v346_v49  ;;  %v349_v3 = vpack.c.b16 %v347_v50, %v347_v50  ;;  %v493_v4 = vpack.c.b16 %v491_v53, %v491_v53  ;;  %v494_v5 = vpack.c.b16 %v492_v54, %v492_v54 }
 0x129   : > { %v365_v15 = vsel %vm362_vm6, %v348_v2, %v355_v59  ;;  %v368_v16 = vsel %vm362_vm6, %v349_v3, %v356_v60  ;;  %v509_v17 = vsel %vm362_vm6, %v493_v4, %v500_v63  ;;  %v512_v19 = vsel %vm362_vm6, %v494_v5, %v501_v1 }
 0x12e   : > { %v1128_v39 = vpop.permute.xlu0 %1127 }
 0x12f   : > { %v1130_v42 = vunpack.i.h.bf16 %v1128_v39  ;;  %v1129_v43 = vunpack.i.l.bf16 %v1128_v39  ;;  %v1133_v44 = vpop.permute.xlu1 %1132 }
 0x130   : > { %v1135_v47 = vunpack.i.h.bf16 %v1133_v44  ;;  %v1134_v48 = vunpack.i.l.bf16 %v1133_v44 }
 0x131   : > { %v334_v51 = vsel %vm255_vm11, %v1129_v43, %v1130_v42  ;;  %v335_v52 = vsel %vm255_vm11, %v1130_v42, %v1129_v43 }
 0x132   : > { %v340_v55 = vsel %vm299_vm10, %v1134_v48, %v1135_v47  ;;  %v341_v56 = vsel %vm299_vm10, %v1135_v47, %v1134_v48 }
 0x133   : > { %v342_v57 = vsel %vm255_vm11, %v340_v55, %v335_v52  ;;  %v488_v58 = vsel %vm258_vm12, %v334_v51, %v341_v56 }
 0x134   : > { %v489_v61 = vpack.c.bf16 %v488_v58, %v340_v55  ;;  %v344_v62 = vpack.c.bf16 %v334_v51, %v342_v57 }
 0x136   : > { %v358_v6 = vunpack.c.l.b16 %v344_v62  ;;  %v359_v7 = vunpack.c.h.b16 %v344_v62  ;;  %v503_v8 = vunpack.c.l.b16 %v489_v61  ;;  %v504_v9 = vunpack.c.h.b16 %v489_v61 }
 0x138   : > { %v360_v10 = vpack.c.b16 %v358_v6, %v358_v6  ;;  %v361_v11 = vpack.c.b16 %v359_v7, %v359_v7  ;;  %v505_v12 = vpack.c.b16 %v503_v8, %v503_v8  ;;  %v506_v13 = vpack.c.b16 %v504_v9, %v504_v9 }
 0x13a   : > { %v371_v20 = vsel %vm369_vm7, %v365_v15, %v360_v10  ;;  %v373_v21 = vsel %vm369_vm7, %v368_v16, %v361_v11  ;;  %v514_v22 = vsel %vm369_vm7, %v509_v17, %v505_v12  ;;  %v516_v23 = vsel %vm369_vm7, %v512_v19, %v506_v13 }
 0x13b   : > { %v449_v24 = vsel %vm415_vm8, %v371_v20, 0  ;;  %v451_v25 = vsel %vm415_vm8, %v373_v21, 0  ;;  %v520_v26 = vsel %vm415_vm8, %v514_v22, 0  ;;  %v522_v29 = vsel %vm415_vm8, %v516_v23, 0 }
 0x13c   : > { %460 = vmatpush.bf16.msra.mxu2 %v449_v24  ;;  %473 = vmatpush.bf16.msra.mxu3 %v451_v25 }
 0x13d   : > { %531 = vmatpush.bf16.msrb.mxu0 %v520_v26  ;;  %544 = vmatpush.bf16.msrb.mxu1 %v522_v29 }
 0x13f   : > { %1006 = vmatmul.msk.bf16.vlgmr.msra.gmra.mxu2 %vm411_vm9, %v288_v30  ;;  %1007 = vmatmul.msk.bf16.vlgmr.msra.gmra.mxu3 %vm411_vm9, %v288_v30 }
 0x140   : > { %1008 = vmatmul.msk.bf16.vlgmr.msrb.gmra.mxu0 %vm411_vm9, %v480_v33  ;;  %1009 = vmatmul.msk.bf16.vlgmr.msrb.gmra.mxu1 %vm411_vm9, %v480_v33 }
 0x143   : > { %v429_v34 = vpop.f32.mrf.mxu0  ;;  %v442_v35 = vpop.f32.mrf.mxu1 }
 0x14b   : > { %v431_v36 = vpop.f32.mrf.mxu0  ;;  %v444_v37 = vpop.f32.mrf.mxu1 }
 0x1bd   : > { %v533_v38 = vpop.f32.mrf.mxu0  ;;  %v546_v39 = vpop.f32.mrf.mxu1 }
 0x1c2   : > { %v462_v40 = vpop.f32.mrf.mxu2  ;;  %v475_v41 = vpop.f32.mrf.mxu3 }
 0x1c3   : > { %v463_v42 = vadd.f32 %v462_v40, %v429_v34  ;;  %v476_v43 = vadd.f32 %v475_v41, %v442_v35 }
 0x1c5   : > { %v550_v44 = vadd.f32 %v533_v38, %v463_v42  ;;  %v551_v45 = vadd.f32 %v546_v39, %v476_v43  ;;  %v535_v46 = vpop.f32.mrf.mxu0  ;;  %v548_v47 = vpop.f32.mrf.mxu1 }
 0x1c7   : > { %v552_v48 = vsel %vm369_vm7, %v550_v44, 0.0  ;;  %v553_v49 = vsel %vm369_vm7, %v551_v45, 0.0  ;;  %v557_v50 = vmul.f32 %v550_v44, %v550_v44  ;;  %v558_v51 = vmul.f32 %v551_v45, %v551_v45 }
 0x1c8   : > { %v554_v52 = vadd.f32 %v553_v49, %v552_v48 }
 0x1c9   : > { %v559_v53 = vsel %vm369_vm7, %v557_v50, 0.0  ;;  %v560_v54 = vsel %vm369_vm7, %v558_v51, 0.0 }
 0x1ca   : > { %v464_v55 = vpop.f32.mrf.mxu2  ;;  %v477_v56 = vpop.f32.mrf.mxu3  ;;  %555 = vadd.xlane.f32.xlu2 %v554_v52  ;;  %v561_v57 = vadd.f32 %v560_v54, %v559_v53 }
 0x1cc   : > { %562 = vadd.xlane.f32.xlu0 %v561_v57 }
 0x23d   : > { %v556_v58 = vpop.xlane.xlu2 %555 }
 0x23e   : > { %v564_v59 = vmul.f32 0.00390625, %v556_v58  ;;  %v676_v58 = vld [vmem:[#allocation7 + $0x2] sm:$0x3] }
 0x23f   : > { %v563_v60 = vpop.xlane.xlu0 %562 }
 0x240   : > { %v565_v61 = vmul.f32 0.00390625, %v563_v60  ;;  %v566_v62 = vmul.f32 %v564_v59, %v564_v59  ;;  %v569_v9 = vsub.f32 %v550_v44, %v564_v59  ;;  %v570_v10 = vsub.f32 %v551_v45, %v564_v59 }
 0x242   : > { %v567_v63 = vsub.f32 %v565_v61, %v566_v62 }
 0x244   : > { %v568_v1 = vmax.f32 %v567_v63, 0.0 }
 0x246   : > { %v571_v2 = vadd.f32 1e-05, %v568_v1 }
 0x248   : > { %1176 = vrsqrt.f32 %v571_v2  ;;  %vm578_vm14 = vweird.f32 %v571_v2 }
 0x24e   : > { %v1177_v3 = vpop.eup %1176 }
 0x24f   : > { %v573_v4 = vmul.f32 %v1177_v3, %v571_v2  ;;  %vm579_vm13 = vweird.f32 %v1177_v3 }
 0x250   : > { %vm580_vm15 = vmor %vm578_vm14, %vm579_vm13 }
 0x251   : > { %v574_v5 = vmul.f32 %v1177_v3, %v573_v4 }
 0x253   : > { %v575_v6 = vmul.f32 0.5, %v574_v5 }
 0x255   : > { %v576_v7 = vsub.f32 1.5, %v575_v6 }
 0x257   : > { %v577_v8 = vmul.f32 %v1177_v3, %v576_v7 }
 0x259   : > { %v581_v11 = vsel %vm580_vm15, %v1177_v3, %v577_v8 }
 0x25a   : > { %v582_v12 = vmul.f32 %v581_v11, %v569_v9  ;;  %v583_v13 = vmul.f32 %v581_v11, %v570_v10 }
 0x25c   : > { %v584_v15 = vmax.f32 %v582_v12, 0.0  ;;  %v585_v16 = vmax.f32 %v583_v13, 0.0 }
 0x25e   : > { %v1136_v17 = vpack.i.bf16 %v585_v16, %v584_v15  ;;  %v678_v19 = vpack.c.bf16 %v585_v16, %v584_v15 }
 0x260   : > { %1137 = vrot.lane.b32.xlu1 %v1136_v17, %s1346_s20  ;;  %v686_v21 = vunpack.c.l.b16 %v678_v19  ;;  %v687_v22 = vunpack.c.h.b16 %v678_v19 }
 0x262   : > { %v688_v30 = vpack.c.b16 %v686_v21, %v686_v21  ;;  %v689_v33 = vpack.c.b16 %v687_v22, %v687_v22 }
 0x264   : > { %v690_v31 = vrot.slane %v688_v30, 6  ;;  %v691_v50 = vrot.slane %v689_v33, 6 }
 0x268   : > { %1142 = vrot.lane.b32.xlu1 %v1136_v17, %s1347_s9 }
 0x270   : > { %1147 = vrot.lane.b32.xlu1 %v1136_v17, %s1348_s24 }
 0x278   : > { %1152 = vrot.lane.b32.xlu1 %v1136_v17, %s1349_s25 }
 0x2d2   : > { %v1138_v20 = vpop.permute.xlu1 %1137 }
 0x2d3   : > { %v1140_v23 = vunpack.i.h.bf16 %v1138_v20  ;;  %v1139_v24 = vunpack.i.l.bf16 %v1138_v20 }
 0x2d5   : > { %v590_v34 = vsel %vm269_vm0, %v1139_v24, %v1140_v23  ;;  %v591_v35 = vsel %vm269_vm0, %v1140_v23, %v1139_v24 }
 0x2da   : > { %v1143_v25 = vpop.permute.xlu1 %1142 }
 0x2db   : > { %v1145_v26 = vunpack.i.h.bf16 %v1143_v25  ;;  %v1144_v29 = vunpack.i.l.bf16 %v1143_v25 }
 0x2dd   : > { %v596_v36 = vsel %vm281_vm1, %v1144_v29, %v1145_v26  ;;  %v597_v37 = vsel %vm281_vm1, %v1145_v26, %v1144_v29 }
 0x2de   : > { %v600_v38 = vsel %vm1504_vm2, %v591_v35, %v596_v36  ;;  %v601_v39 = vsel %vm1508_vm3, %v590_v34, %v597_v37  ;;  %v598_v40 = vsel %vm1512_vm4, %v596_v36, %v591_v35  ;;  %v599_v41 = vsel %vm1516_vm5, %v597_v37, %v590_v34 }
 0x2df   : > { %v1171_v42 = vpack.i.bf16 %v601_v39, %v600_v38  ;;  %v1161_v43 = vpack.i.bf16 %v599_v41, %v598_v40  ;;  %v677_v44 = vpack.c.bf16 %v599_v41, %v598_v40  ;;  %v679_v45 = vpack.c.bf16 %v601_v39, %v600_v38 }
 0x2e1   : > { %1172 = vrot.lane.b32.xlu0 %v1171_v42, %s1349_s25  ;;  %1162 = vrot.lane.b32.xlu2 %v1161_v43, %s1349_s25  ;;  %v681_v46 = vunpack.c.l.b16 %v677_v44  ;;  %v682_v27 = vunpack.c.h.b16 %v677_v44  ;;  %v693_v28 = vunpack.c.l.b16 %v679_v45  ;;  %v694_v47 = vunpack.c.h.b16 %v679_v45 }
 0x2e2   : > { %1157 = vrot.lane.b32.xlu1 %v1161_v43, %s1348_s24  ;;  %v1148_v59 = vpop.permute.xlu1 %1147 }
 0x2e3   : > { %v683_v48 = vpack.c.b16 %v681_v46, %v681_v46  ;;  %v684_v49 = vpack.c.b16 %v682_v27, %v682_v27  ;;  %v695_v32 = vpack.c.b16 %v693_v28, %v693_v28  ;;  %v696_v51 = vpack.c.b16 %v694_v47, %v694_v47 }
 0x2e4   : > { %v1150_v63 = vunpack.i.h.bf16 %v1148_v59  ;;  %v1149_v1 = vunpack.i.l.bf16 %v1148_v59 }
 0x2e5   : > { %v699_v52 = vsel %vm362_vm6, %v683_v48, %v690_v31  ;;  %v702_v53 = vsel %vm362_vm6, %v684_v49, %v691_v50 }
 0x2e6   : > { %v704_v54 = vsel %vm369_vm7, %v699_v52, %v695_v32  ;;  %v706_v55 = vsel %vm369_vm7, %v702_v53, %v696_v51  ;;  %v622_v4 = vsel %vm255_vm11, %v1149_v1, %v1150_v63  ;;  %v623_v9 = vsel %vm255_vm11, %v1150_v63, %v1149_v1 }
 0x2e7   : > { %v710_v56 = vsel %vm415_vm8, %v704_v54, 0  ;;  %v712_v57 = vsel %vm415_vm8, %v706_v55, 0 }
 0x2e8   : > { %721 = vmatpush.bf16.msrb.mxu2 %v710_v56  ;;  %734 = vmatpush.bf16.msrb.mxu3 %v712_v57 }
 0x2ea   : > { %1167 = vrot.lane.b32.xlu1 %v1171_v42, %s1348_s24  ;;  %v1153_v60 = vpop.permute.xlu1 %1152 }
 0x2eb   : > { %1010 = vmatmul.msk.bf16.vlgmr.msrb.gmra.mxu2 %vm411_vm9, %v676_v58  ;;  %1011 = vmatmul.msk.bf16.vlgmr.msrb.gmra.mxu3 %vm411_vm9, %v676_v58  ;;  %v1155_v61 = vunpack.i.h.bf16 %v1153_v60  ;;  %v1154_v62 = vunpack.i.l.bf16 %v1153_v60 }
 0x2ed   : > { %v629_v2 = vsel %vm299_vm10, %v1155_v61, %v1154_v62  ;;  %v628_v5 = vsel %vm299_vm10, %v1154_v62, %v1155_v61 }
 0x2ee   : > { %v779_v6 = vsel %vm258_vm12, %v622_v4, %v629_v2  ;;  %v630_v11 = vsel %vm255_vm11, %v628_v5, %v623_v9 }
 0x2ef   : > { %v780_v12 = vpack.c.bf16 %v779_v6, %v628_v5  ;;  %v632_v21 = vpack.c.bf16 %v622_v4, %v630_v11 }
 0x2f1   : > { %v790_v25 = vunpack.c.l.b16 %v780_v12  ;;  %v791_v26 = vunpack.c.h.b16 %v780_v12  ;;  %v654_v35 = vunpack.c.l.b16 %v632_v21  ;;  %v655_v36 = vunpack.c.h.b16 %v632_v21 }
 0x2f3   : > { %v792_v38 = vpack.c.b16 %v790_v25, %v790_v25  ;;  %v793_v39 = vpack.c.b16 %v791_v26, %v791_v26  ;;  %v656_v49 = vpack.c.b16 %v654_v35, %v654_v35  ;;  %v657_v50 = vpack.c.b16 %v655_v36, %v655_v36 }
 0x2f5   : > { %v794_v60 = vrot.slane %v792_v38, 6  ;;  %v795_v61 = vrot.slane %v793_v39, 6  ;;  %v658_v62 = vrot.slane %v656_v49, 6  ;;  %v659_v14 = vrot.slane %v657_v50, 6 }
 0x33b   : > { %v1163_v3 = vpop.permute.xlu2 %1162 }
 0x33c   : > { %v1165_v7 = vunpack.i.h.bf16 %v1163_v3  ;;  %v1164_v8 = vunpack.i.l.bf16 %v1163_v3 }
 0x33e   : > { %v613_v16 = vsel %vm299_vm10, %v1164_v8, %v1165_v7  ;;  %v614_v17 = vsel %vm299_vm10, %v1165_v7, %v1164_v8 }
 0x353   : > { %v1173_v22 = vpop.permute.xlu0 %1172 }
 0x354   : > { %v1158_v10 = vpop.permute.xlu1 %1157  ;;  %v1175_v33 = vunpack.i.h.bf16 %v1173_v22  ;;  %v1174_v34 = vunpack.i.l.bf16 %v1173_v22 }
 0x355   : > { %v1160_v13 = vunpack.i.h.bf16 %v1158_v10  ;;  %v1159_v15 = vunpack.i.l.bf16 %v1158_v10 }
 0x356   : > { %v643_v46 = vsel %vm299_vm10, %v1174_v34, %v1175_v33  ;;  %v644_v27 = vsel %vm299_vm10, %v1175_v33, %v1174_v34 }
 0x357   : > { %v607_v19 = vsel %vm255_vm11, %v1159_v15, %v1160_v13  ;;  %v608_v20 = vsel %vm255_vm11, %v1160_v13, %v1159_v15 }
 0x358   : > { %v615_v23 = vsel %vm255_vm11, %v613_v16, %v608_v20  ;;  %v776_v24 = vsel %vm258_vm12, %v607_v19, %v614_v17  ;;  %v774_v17 = vld [vmem:[#allocation7 + $0x4] sm:$0x3] }
 0x359   : > { %v617_v29 = vpack.c.bf16 %v607_v19, %v615_v23  ;;  %v777_v30 = vpack.c.bf16 %v776_v24, %v613_v16  ;;  %v602_v16 = vld [vmem:[#allocation7] sm:$0x3] }
 0x35b   : > { %v649_v42 = vunpack.c.l.b16 %v617_v29  ;;  %v650_v43 = vunpack.c.h.b16 %v617_v29  ;;  %v785_v44 = vunpack.c.l.b16 %v777_v30  ;;  %v786_v45 = vunpack.c.h.b16 %v777_v30 }
 0x35c   : > { %v1168_v37 = vpop.permute.xlu1 %1167 }
 0x35d   : > { %v1170_v40 = vunpack.i.h.bf16 %v1168_v37  ;;  %v1169_v41 = vunpack.i.l.bf16 %v1168_v37  ;;  %v651_v52 = vpack.c.b16 %v649_v42, %v649_v42  ;;  %v652_v53 = vpack.c.b16 %v650_v43, %v650_v43 }
 0x35e   : > { %v787_v54 = vpack.c.b16 %v785_v44, %v785_v44  ;;  %v788_v55 = vpack.c.b16 %v786_v45, %v786_v45 }
 0x35f   : > { %v637_v28 = vsel %vm255_vm11, %v1169_v41, %v1170_v40  ;;  %v638_v47 = vsel %vm255_vm11, %v1170_v40, %v1169_v41  ;;  %v667_v3 = vsel %vm362_vm6, %v651_v52, %v658_v62  ;;  %v670_v4 = vsel %vm362_vm6, %v652_v53, %v659_v14 }
 0x360   : > { %v645_v48 = vsel %vm255_vm11, %v643_v46, %v638_v47  ;;  %v782_v31 = vsel %vm258_vm12, %v637_v28, %v644_v27  ;;  %v803_v5 = vsel %vm362_vm6, %v787_v54, %v794_v60  ;;  %v806_v6 = vsel %vm362_vm6, %v788_v55, %v795_v61 }
 0x361   : > { %v647_v32 = vpack.c.bf16 %v637_v28, %v645_v48  ;;  %v783_v51 = vpack.c.bf16 %v782_v31, %v643_v46 }
 0x363   : > { %v661_v56 = vunpack.c.l.b16 %v647_v32  ;;  %v662_v57 = vunpack.c.h.b16 %v647_v32  ;;  %v797_v58 = vunpack.c.l.b16 %v783_v51  ;;  %v798_v59 = vunpack.c.h.b16 %v783_v51 }
 0x365   : > { %v663_v63 = vpack.c.b16 %v661_v56, %v661_v56  ;;  %v664_v1 = vpack.c.b16 %v662_v57, %v662_v57  ;;  %v799_v18 = vpack.c.b16 %v797_v58, %v797_v58  ;;  %v800_v2 = vpack.c.b16 %v798_v59, %v798_v59 }
 0x367   : > { %v672_v7 = vsel %vm369_vm7, %v667_v3, %v663_v63  ;;  %v674_v8 = vsel %vm369_vm7, %v670_v4, %v664_v1  ;;  %v808_v9 = vsel %vm369_vm7, %v803_v5, %v799_v18  ;;  %v810_v10 = vsel %vm369_vm7, %v806_v6, %v800_v2 }
 0x368   : > { %v743_v11 = vsel %vm415_vm8, %v672_v7, 0  ;;  %v745_v12 = vsel %vm415_vm8, %v674_v8, 0  ;;  %v814_v13 = vsel %vm415_vm8, %v808_v9, 0  ;;  %v816_v15 = vsel %vm415_vm8, %v810_v10, 0 }
 0x369   : > { %754 = vmatpush.bf16.msra.mxu0 %v743_v11  ;;  %767 = vmatpush.bf16.msra.mxu1 %v745_v12 }
 0x36a   : > { %825 = vmatpush.bf16.msra.mxu2 %v814_v13  ;;  %838 = vmatpush.bf16.msra.mxu3 %v816_v15 }
 0x36c   : > { %1012 = vmatmul.msk.bf16.vlgmr.msra.gmra.mxu0 %vm411_vm9, %v602_v16  ;;  %1013 = vmatmul.msk.bf16.vlgmr.msra.gmra.mxu1 %vm411_vm9, %v602_v16 }
 0x36d   : > { %1014 = vmatmul.msk.bf16.vlgmr.msra.gmra.mxu2 %vm411_vm9, %v774_v17  ;;  %1015 = vmatmul.msk.bf16.vlgmr.msra.gmra.mxu3 %vm411_vm9, %v774_v17 }
 0x36e   : > { %v723_v19 = vpop.f32.mrf.mxu2  ;;  %v736_v20 = vpop.f32.mrf.mxu3 }
 0x376   : > { %v725_v21 = vpop.f32.mrf.mxu2  ;;  %v738_v22 = vpop.f32.mrf.mxu3 }
 0x3e9   : > { %v756_v23 = vpop.f32.mrf.mxu0  ;;  %v769_v24 = vpop.f32.mrf.mxu1 }
 0x3ea   : > { %v757_v25 = vadd.f32 %v756_v23, %v723_v19  ;;  %v770_v26 = vadd.f32 %v769_v24, %v736_v20 }
 0x3f0   : > { %v827_v29 = vpop.f32.mrf.mxu2  ;;  %v840_v30 = vpop.f32.mrf.mxu3 }
 0x3f1   : > { %v844_v33 = vadd.f32 %v827_v29, %v757_v25  ;;  %v845_v34 = vadd.f32 %v840_v30, %v770_v26  ;;  %v758_v35 = vpop.f32.mrf.mxu0  ;;  %v771_v36 = vpop.f32.mrf.mxu1 }
 0x3f3   : > { %v846_v37 = vsel %vm369_vm7, %v844_v33, 0.0  ;;  %v847_v38 = vsel %vm369_vm7, %v845_v34, 0.0  ;;  %v851_v39 = vmul.f32 %v844_v33, %v844_v33  ;;  %v852_v40 = vmul.f32 %v845_v34, %v845_v34 }
 0x3f4   : > { %v848_v41 = vadd.f32 %v847_v38, %v846_v37 }
 0x3f5   : > { %v853_v42 = vsel %vm369_vm7, %v851_v39, 0.0  ;;  %v854_v43 = vsel %vm369_vm7, %v852_v40, 0.0 }
 0x3f6   : > { %849 = vadd.xlane.f32.xlu1 %v848_v41  ;;  %v855_v44 = vadd.f32 %v854_v43, %v853_v42 }
 0x3f8   : > { %856 = vadd.xlane.f32.xlu2 %v855_v44  ;;  %v829_v45 = vpop.f32.mrf.mxu2  ;;  %v842_v46 = vpop.f32.mrf.mxu3 }
 0x469   : > { %v850_v27 = vpop.xlane.xlu1 %849 }
 0x46a   : > { %v858_v28 = vmul.f32 0.00390625, %v850_v27 }
 0x46b   : > { %v857_v47 = vpop.xlane.xlu2 %856 }
 0x46c   : > { %v859_v48 = vmul.f32 0.00390625, %v857_v47  ;;  %v860_v31 = vmul.f32 %v858_v28, %v858_v28  ;;  %v864_v57 = vsub.f32 %v845_v34, %v858_v28  ;;  %v863_v59 = vsub.f32 %v844_v33, %v858_v28 }
 0x46e   : > { %v861_v49 = vsub.f32 %v859_v48, %v860_v31 }
 0x470   : > { %v862_v50 = vmax.f32 %v861_v49, 0.0 }
 0x472   : > { %v865_v32 = vadd.f32 1e-05, %v862_v50 }
 0x474   : > { %1178 = vrsqrt.f32 %v865_v32  ;;  %vm872_vm1 = vweird.f32 %v865_v32 }
 0x47a   : > { %v1179_v51 = vpop.eup %1178 }
 0x47b   : > { %v867_v52 = vmul.f32 %v1179_v51, %v865_v32  ;;  %vm873_vm0 = vweird.f32 %v1179_v51 }
 0x47c   : > { %vm874_vm2 = vmor %vm872_vm1, %vm873_vm0 }
 0x47d   : > { %v868_v53 = vmul.f32 %v1179_v51, %v867_v52 }
 0x47f   : > { %v869_v54 = vmul.f32 0.5, %v868_v53 }
 0x481   : > { %v870_v55 = vsub.f32 1.5, %v869_v54 }
 0x483   : > { %v871_v56 = vmul.f32 %v1179_v51, %v870_v55 }
 0x485   : > { %v875_v58 = vsel %vm874_vm2, %v1179_v51, %v871_v56 }
 0x486   : > { %v877_v60 = vmul.f32 %v875_v58, %v864_v57  ;;  %v876_v61 = vmul.f32 %v875_v58, %v863_v59 }
 0x488   : > { %v880_v62 = vrot.slane %v877_v60, 4 }
 0x48a   : > { %v881_v14 = vsel %vm369_vm7, %v876_v61, %v880_v62 }
 0x48b   : > { %v883_v63 = vadd.f32 %v881_v14, %v1484_v0 }
 0x48d   : > { %884 = vst [vmem:[%s221_s30] sm:$0xff] %v883_v63 }
 0x48e   : > { %1297 = shalt.err (!%p1294_p9)
}
 0x48f   : > { %1033 = dma.vmem_to_hbm [thread:$0]  (%p1439_p4), %s900_s5, 128, %s902_s6, %s886_s19  }
 0x490 PF: > { %s913_s10 = sand.u32 1, %s1328_s12   ;;  %p1750_p10 = scmp.ge.s32.totalorder %s1340_s15, 2 }
 0x491   : > { %s914_s9 = scalar_lea.sflag [#allocation4], %s913_s10 }
 0x492   : > { %p1047_p13 = pnand %p1750_p10, %p1443_p6 }
 0x494   : > { %p1048_p11 = pneg %p1047_p13 }
 0x496   : > { %1323 = dma.done.wait (%p1048_p11), %s914_s9, 128  }
 0x497   : > { %1325 = vsyncadd (%p1048_p11), %s914_s9, 4294967168  ;;  %p17_p0 = scmp.ge.s32.totalorder %s1413_s4, 4   ;;  %s1751_s12 = smov %s1332_s13 }
 0x498   : > { %s1752_s13 = smov %s1336_s14  ;;  %s1753_s14 = smov %s1424_s7 }
 0x499   : > { %s1754_s15 = smov %s1413_s4  ;;  %19 = sbr.rel (!%p17_p0) target bundleno = 6 (0x6), region = 89 }
 0x49e   :  { %920 = vsyncpa [#allocation3], 1 }
 0x49f   :  { %922 = vsyncpa [#allocation3 + $0x1], 1 }
 0x4a0   :  { %923 = vsyncpa [#allocation6], 1 }
 0x4a1   :  { %924 = vsyncpa [#allocation4], 1 }
 0x4a2   :  { %926 = vsyncpa [#allocation4 + $0x1], 1 }

</bundles_post_ra>
